<compile_context>
chip_gen: v7x
topology: tpu7x:2x2x1
jax: 0.10.0
libtpu: 0.0.40
codegen_flags: <defaults>
</compile_context>

<pallas_src>
import jax
import jax.numpy as jnp
from jax.experimental import pallas as pl
from jax.experimental.pallas import tpu as pltpu


def _permute_021_kernel(x_ref, o_ref):
    # x_ref: (tc, tt) VMEM tile, o_ref: (tt, tc) VMEM tile (batch dim squeezed).
    # The block-level transpose is expressed by the output index_map; the body
    # is a single intra-tile transpose on the XLU.
    o_ref[...] = x_ref[...].T


def _auto_tiles(C, T, itemsize):
    """Pick (tc, tt) tiles for a [C, T] -> [T, C] slab transpose.

    tc (output lane dim): take the whole C axis when C <= 1024 so each output
    block row is one contiguous HBM run; otherwise 1024 (128-aligned, ragged
    edge masked).  tt (input lane dim): dtype-aware target so input DMA runs
    stay >= ~2 KiB.  Worst case tile is 2 MiB/buffer -> ~8 MiB double-buffered.
    """
    tc = C if C <= 1024 else 1024
    tt_cap = 512 if itemsize >= 4 else 1024
    tt = T if T <= tt_cap else tt_cap
    return tc, tt


def _check_tile(name, t, dim):
    # Per-dim Mosaic constraint: a block dim must be a multiple of 128 (it then
    # also satisfies the sublane rule) or equal the full array dim.
    if not (0 < t <= dim) or (t != dim and t % 128 != 0):
        raise ValueError(
            f"{name}={t} invalid for dim {dim}: must be a multiple of 128 or "
            f"equal to the full dimension.")


def permute_021(x, *, tc=None, tt=None):
    """Pallas implementation of x.permute(0, 2, 1) for a [B, C, T] tensor."""
    B, C, T = x.shape
    itemsize = jnp.dtype(x.dtype).itemsize
    auto_tc, auto_tt = _auto_tiles(C, T, itemsize)
    tc = auto_tc if tc is None else tc
    tt = auto_tt if tt is None else tt
    _check_tile("tc", tc, C)
    _check_tile("tt", tt, T)

    # Large parallel axis first, batch last (megacore-friendly even at B == 1).
    grid = (pl.cdiv(T, tt), pl.cdiv(C, tc), B)

    return pl.pallas_call(
        _permute_021_kernel,
        out_shape=jax.ShapeDtypeStruct((B, T, C), x.dtype),
        grid=grid,
        # Leading None squeezes the batch dim out of the kernel view.
        in_specs=[pl.BlockSpec((None, tc, tt), lambda ti, ci, b: (b, ci, ti))],
        # Block-level transpose: output block (ti, ci) gets the transpose of
        # input block (ci, ti).
        out_specs=pl.BlockSpec((None, tt, tc), lambda ti, ci, b: (b, ti, ci)),
        compiler_params=pltpu.CompilerParams(
            # Pure data movement, every grid point independent.
            dimension_semantics=("parallel", "parallel", "parallel"),
        ),
        # 0 FLOPs, 1 HBM read + 1 HBM write of the whole tensor.
        cost_estimate=pl.CostEstimate(
            flops=0,
            transcendentals=0,
            bytes_accessed=2 * B * C * T * itemsize,
        ),
    )(x)


# Below this per-batch slab size the ~0.35us/step Pallas overhead dominates and
# XLA's fused transpose is at least as fast.
_MIN_SLAB_BYTES = 64 * 1024


class PermutePallas:
    """Mirror of the PyTorch Permute module (no parameters)."""

    def __init__(self, permutation):
        self.permutation = tuple(permutation)

    def __call__(self, x):
        perm = self.permutation
        if perm == tuple(range(x.ndim)):
            return x  # identity permutation
        if perm == (0, 2, 1) and x.ndim == 3:
            B, C, T = x.shape
            itemsize = jnp.dtype(x.dtype).itemsize
            if C * T * itemsize >= _MIN_SLAB_BYTES:
                return permute_021(x)
        # TODO(synk): general N-D permutations and tiny slabs fall back to XLA's
        # transpose; the better fix for the StatsPooling1D path is to fuse this
        # permute into the pooling kernel and skip the HBM round trip.
        return jnp.transpose(x, perm)


if __name__ == "__main__":
    root = jax.random.PRNGKey(0)
    k0, k1, k2, k3, k4 = jax.random.split(root, 5)

    # 1) Aligned shape, explicit multi-block tiles: exercises the block-level
    #    transpose across a (3, 2, 2) grid.
    B, C, T = 2, 256, 384
    x = jax.random.normal(k0, (B, C, T), dtype=jnp.float32)
    ref = jnp.transpose(x, (0, 2, 1))
    y = jax.block_until_ready(permute_021(x, tc=128, tt=128))
    assert y.shape == (B, T, C) and y.dtype == x.dtype
    assert jnp.array_equal(y, ref)

    # 2) Auto-picked tiles (full-C / full-T contiguous slabs).
    y2 = jax.block_until_ready(permute_021(x))
    assert jnp.array_equal(y2, ref)

    # 3) Ragged edges: non-128-multiple dims with 128-tiles -> masked edge
    #    blocks on both axes; results must stay exact.
    xr = jax.random.normal(k1, (1, 320, 200), dtype=jnp.float32)
    yr = jax.block_until_ready(permute_021(xr, tc=128, tt=128))
    assert jnp.array_equal(yr, jnp.transpose(xr, (0, 2, 1)))

    # 4) Small lane-friendly shape using block == full-dim path.
    xs = jax.random.normal(k2, (2, 8, 128), dtype=jnp.float32)
    ys = jax.block_until_ready(permute_021(xs))
    assert jnp.array_equal(ys, jnp.transpose(xs, (0, 2, 1)))

    # 5) Module wrapper, bf16 (dtype-aware tiles), Pallas path.
    mod = PermutePallas((0, 2, 1))
    xb = jax.random.normal(k3, (2, 256, 256), dtype=jnp.float32).astype(jnp.bfloat16)
    yb = jax.block_until_ready(mod(xb))
    assert yb.shape == (2, 256, 256) and jnp.array_equal(yb, jnp.transpose(xb, (0, 2, 1)))

    # 6) Module wrapper, tiny unaligned shape -> XLA fallback, same semantics.
    xt = jax.random.normal(k4, (2, 4, 16), dtype=jnp.float32)
    yt = jax.block_until_ready(mod(xt))
    assert yt.shape == (2, 16, 4) and jnp.array_equal(yt, jnp.transpose(xt, (0, 2, 1)))

    # 7) Identity permutation.
    assert PermutePallas((0, 1, 2))(xt) is xt

    print("KERNEL_OK")
</pallas_src>

<mosaic_0001>
module attributes {stable_mosaic.version = 11 : i64} {
  func.func @_permute_021_kernel(%arg0: i32, %arg1: i32, %arg2: i32, %arg3: memref<1x128x128xf32, #tpu.memory_space<vmem>>, %arg4: memref<1x128x128xf32, #tpu.memory_space<vmem>>) attributes {dimension_semantics = [#tpu.dimension_semantics<parallel>, #tpu.dimension_semantics<parallel>, #tpu.dimension_semantics<parallel>], iteration_bounds = array<i64: 3, 2, 2>, scalar_prefetch = 0 : i64, scratch_operands = 0 : i64, tpu.core_type = #tpu.core_type<tc>, window_params = [{transform_indices = @transform_0, window_bounds = array<i64: 1, 128, 128>}, {transform_indices = @transform_1, window_bounds = array<i64: 1, 128, 128>}]} {
    %c0 = arith.constant 0 : index
    %c0_0 = arith.constant 0 : index
    %c0_1 = arith.constant 0 : index
    %0 = vector.load %arg3[%c0, %c0_0, %c0_1] : memref<1x128x128xf32, #tpu.memory_space<vmem>>, vector<1x128x128xf32>
    %1 = vector.shape_cast %0 : vector<1x128x128xf32> to vector<128x128xf32>
    %2 = tpu.transpose %1, [1, 0] : vector<128x128xf32> -> vector<128x128xf32>
    %c0_2 = arith.constant 0 : index
    %c0_3 = arith.constant 0 : index
    %c0_4 = arith.constant 0 : index
    %3 = vector.load %arg4[%c0_2, %c0_3, %c0_4] : memref<1x128x128xf32, #tpu.memory_space<vmem>>, vector<1x128x128xf32>
    %4 = vector.shape_cast %3 : vector<1x128x128xf32> to vector<128x128xf32>
    %5 = vector.shape_cast %2 : vector<128x128xf32> to vector<1x128x128xf32>
    tpu.vector_store %arg4[%c0_2, %c0_3, %c0_4], %5 {strides = array<i32>} : memref<1x128x128xf32, #tpu.memory_space<vmem>>, vector<1x128x128xf32>,
    return
  }
  func.func @transform_0(%arg0: i32, %arg1: i32, %arg2: i32) -> (i32, i32, i32) {
    %c0_i32 = arith.constant 0 : i32
    return %arg2, %arg1, %arg0 : i32, i32, i32
  }
  func.func @transform_1(%arg0: i32, %arg1: i32, %arg2: i32) -> (i32, i32, i32) {
    %c0_i32 = arith.constant 0 : i32
    return %arg2, %arg0, %arg1 : i32, i32, i32
  }
}

</mosaic_0001>

<bundles_post_ra>
// kernel: tpu_custom_call.1
= control target key start
LH: loop header
LB: loop body
LE: loop exit
PB: predicated region body
PF: predicated region fallthrough
CT: control target
= control target key end

     0   :  { %6 = vsyncpa [#allocation3], 0  ;;  %s978_s0 = inlined_call_operand.hbm [shape: f32[2,256,384], index: 0, kind: input, shape index: {}]   ;;  %s979_s1 = inlined_call_operand.hbm [shape: f32[2,384,256], index: 1, kind: output, shape index: {}]  }
   0x1   :  { %8 = vsyncpa [#allocation3 + $0x1], 0 }
   0x2   :  { %9 = vsyncpa [#allocation4], 0 }
   0x3   :  { %11 = vsyncpa [#allocation4 + $0x1], 0  ;;  %s681_s6 = smov 0   ;;  %s683_s7 = smov 0  }
   0x4   :  { %s685_s8 = smov 0   ;;  %s687_s9 = smov 0  }
   0x5   :  { %s689_s10 = smov 0   ;;  %s691_s11 = smov 0  }
   0x6   :  { %s693_s12 = smov 0   ;;  %s695_s13 = smov 0  }
   0x7   :  { %s697_s14 = smov 0   ;;  %s699_s15 = smov 0  }
   0x8   :  { %s701_s16 = smov 0   ;;  %s703_s17 = smov 0  }
   0x9   :  { %s705_s18 = smov 0  }
   0xa LB: > { %985 = sst [smem:[#allocation8_spill]] %s633_s11  ;;  %s348_s19 = sadd.s32 4294967295, %s661_s18   ;;  %s661_s18 = sphi %s705_s18, %s17_s18   ;;  %s657_s17 = sphi %s703_s17, %s1014_s17   ;;  %s653_s16 = sphi %s701_s16, %s1013_s16   ;;  %s649_s15 = sphi %s699_s15, %s1012_s15   ;;  %s645_s14 = sphi %s697_s14, %s1011_s14   ;;  %s641_s13 = sphi %s695_s13, %s1010_s13   ;;  %s637_s12 = sphi %s693_s12, %s1009_s12   ;;  %s633_s11 = sphi %s691_s11, %s999_s11   ;;  %s629_s10 = sphi %s689_s10, %s1008_s10   ;;  %s625_s9 = sphi %s687_s9, %s1007_s9   ;;  %s621_s8 = sphi %s685_s8, %s1006_s8   ;;  %s617_s7 = sphi %s683_s7, %s1005_s7   ;;  %s613_s6 = sphi %s681_s6, %s1004_s6  }
   0xb   : > { %s349_s20 = sadd.s32 4294967294, %s661_s18   ;;  %s29_s21 = sadd.s32 1, %s649_s15 }
   0xc   : > { %s32_s22 = sadd.s32 1, %s653_s16  ;;  %p30_p0 = scmp.ge.s32.totalorder %s29_s21, 2 }
   0xd   : > { %s36_s23 = sadd.s32 1, %s657_s17  ;;  %s47_s24 = sadd.s32 1, %s633_s11 }
   0xe   : > { %p54_p1 = scmp.ne.s32.totalorder %s633_s11, %s629_s10  ;;  %s1016_s21 = smov (%p30_p0, %s29_s21), 0 }
   0xf   : > { %986 = sst [smem:[#allocation9_spill]] %s1016_s21  ;;  %s1018_s22 = smov (!%p30_p0, %s32_s22), %s653_s16 }
  0x10   : > { %s40_s25 = ssub.s32 %s649_s15, %s1016_s21  ;;  %p55_p2 = scmp.eq.s32.totalorder %s661_s18, 0 }
  0x11   : > { %p34_p3 = scmp.ge.s32.totalorder %s1018_s22, 2  ;;  %p60_p4 = scmp.ne.s32.totalorder %s629_s10, %s625_s9 }
  0x12   : > { %p762_p5 = por %p55_p2, %p54_p1  ;;  %p61_p6 = scmp.eq.s32.totalorder %s348_s19, 0 }
  0x13   : > { %s1020_s22 = smov (%p34_p3, %s1018_s22), 0  ;;  %s1022_s23 = smov (!%p34_p3, %s36_s23), %s657_s17 }
  0x14   : > { %988 = sst [smem:[#allocation10_spill]] %s1020_s22  ;;  %s41_s27 = ssub.s32 %s653_s16, %s1020_s22 }
  0x15   : > { %p771_p7 = por %p61_p6, %p60_p4  ;;  %p38_p8 = scmp.ge.s32.totalorder %s1022_s23, 3 }
  0x16   : > { %s42_s29 = sor.u32 %s41_s27, %s40_s25  ;;  %s77_s30 = sadd.s32 1, %s621_s8 }
  0x17   : > { %p87_p9 = scmp.ne.s32.totalorder %s621_s8, %s617_s7  ;;  %s1024_s23 = smov (%p38_p8, %s1022_s23), 0 }
  0x18   : > { %990 = sst [smem:[#allocation11_spill]] %s1024_s23  ;;  %p88_p10 = scmp.eq.s32.totalorder %s348_s19, 11 }
  0x19   : > { %p93_p11 = scmp.ne.s32.totalorder %s617_s7, %s613_s6  ;;  %s43_s2 = ssub.s32 %s657_s17, %s1024_s23 }
  0x1a   : > { %p94_p12 = scmp.eq.s32.totalorder %s349_s20, 11  ;;  %s44_s3 = sor.u32 %s43_s2, %s42_s29 }
  0x1b   : > { %s72_s4 = sor.u32 %s43_s2, %s40_s25  ;;  %p45_p13 = scmp.eq.s32.totalorder %s44_s3, 0 }
  0x1c   : > { %s74_s5 = sor.u32 %s72_s4, %s41_s27  ;;  %p784_p1 = por %p88_p10, %p87_p9 }
  0x1d   : > { %p75_p0 = scmp.eq.s32.totalorder %s74_s5, 0  ;;  %p796_p2 = por %p94_p12, %p93_p11 }
  0x1e   : > { %s991_s9 = scalar_select %p784_p1, 1, 0 }
  0x1f   : > { %s791_s22 = scalar_select %p45_p13, %s633_s11, %s47_s24  }
  0x20   : > { %s794_s19 = scalar_select %p75_p0, %s621_s8, %s77_s30  }
  0x21   : > { %992 = sst [smem:[#allocation12_spill]] %s791_s22  ;;  %p381_p3 = scmp.lt.s32.totalorder %s661_s18, 12 }
  0x22   : > { %s993_s21 = scalar_select %p796_p2, 1, 0 }
  0x23   : > { %s114_s20 = sand.u32 1, %s633_s11   ;;  %s366_s29 = smul.u32 48, %s653_s16 }
  0x24   : > { %s352_s25 = sshll.u32 %s114_s20, 7  ;;  %s367_s27 = smul.u32 96, %s649_s15 }
  0x25   : > { %s118_s2 = scalar_lea.vmem [#allocation2], %s352_s25  ;;  %s124_s4 = sadd.s32 %s657_s17, %s366_s29 }
  0x26   : > { %s129_s3 = sshll.u32 %s118_s2, 4  ;;  %s126_s5 = sadd.s32 %s367_s27, %s124_s4  ;;  %s805_s3 = int_to_ptr.vmem [resolvable:$true] %s129_s3 }
  0x27   : > { %p809_p4 = pnand %p381_p3, %p762_p5  ;;  %s355_s30 = sshll.u32 %s126_s5, 7 }
  0x28   : > { %s816_s11 = scalar_lea.hbm %s978_s0, %s355_s30  ;;  %s818_s25 = scalar_lea.sflag [#allocation3], %s114_s20 }
  0x29   : > { %s493_s29 = scalar_lea.hbm %s816_s11, 2048  ;;  %p495_p5 = pneg %p809_p4 }
  0x2a   : > { %p494_p6 = scmp.ne.s32.totalorder %s816_s11, %s493_s29  ;;  %s498_s22 = scalar_lea.hbm %s978_s0, 24576 }
  0x2b   : > { %p499_p10 = scmp.lt.u32.totalorder %s816_s11, %s978_s0  ;;  %p500_p11 = scmp.lt.u32.totalorder %s498_s22, %s493_s29 }
  0x2c   : > { %p496_p8 = pnand %p495_p5, %p494_p6  ;;  %p502_p13 = scmp.lt.u32.totalorder %s493_s29, %s816_s11 }
  0x2d   : > { %p501_p12 = por %p500_p11, %p499_p10 }
  0x2e   : > { %p497_p9 = pneg %p496_p8 }
  0x2f   : > { %p503_p0 = por %p502_p13, %p501_p12 }
  0x31   : > { %p504_p3 = pnand %p503_p0, %p497_p9 }
  0x33   : > { %507 = shalt.err (!%p504_p3)
}
  0x34   : > { %s508_s20 = scalar_lea.vmem %s805_s3, 2048  ;;  %s663_s4 = smov [#allocation2]  }
  0x35   : > { %p509_p6 = scmp.ne.s32.totalorder %s805_s3, %s508_s20  ;;  %s513_s5 = sshll.u32 %s663_s4, 4  ;;  %s514_s5 = int_to_ptr.vmem [resolvable:$false] %s513_s5 }
  0x36   : > { %s515_s30 = scalar_lea.vmem %s514_s5, 4096  ;;  %p516_p1 = scmp.lt.s32.totalorder %s805_s3, %s514_s5 }
  0x37   : > { %p511_p8 = pnand %p509_p6, %p495_p5  ;;  %p517_p10 = scmp.lt.s32.totalorder %s515_s30, %s508_s20 }
  0x39   : > { %p512_p2 = pneg %p511_p8  ;;  %p518_p11 = por %p517_p10, %p516_p1 }
  0x3b   : > { %p519_p12 = pnand %p518_p11, %p512_p2 }
  0x3d   : > { %522 = shalt.err (!%p519_p12)
}
  0x3e   : > { %s664_s29 = smov 384   ;;  %s665_s26 = smov 128  }
  0x3f   : > { %s666_s27 = smov 8   ;;  %p356_p5 = scmp.ge.s32.totalorder %s661_s18, 1 }
  0x40   : > { %376 = dma.hbm_to_vmem [thread:$0]  (!%p809_p4), %s816_s11, 2048, %s805_s3, %s818_s25, %s664_s29, %s665_s26, %s666_s27  }
  0x41   : > { %p137_p9 = scmp.lt.s32.totalorder %s661_s18, 13 }
  0x43   : > { %p138_p13 = pnand %p356_p5, %p137_p9 }
  0x44   : > { %s143_s22 = sand.u32 (!%p138_p13), 1, %s629_s10  }
  0x45   : > { %141 = sbr.rel (%p138_p13) target bundleno = 283 (0x11b), region = 24  ;;  %s357_s23 = sshll.u32 (!%p138_p13), %s143_s22, 7 }
  0x46   : > { %s144_s2 = scalar_lea.sflag (!%p138_p13), [#allocation3], %s143_s22  ;;  %s849_s20 = scalar_lea.vmem (!%p138_p13), [#allocation2], %s357_s23 }
  0x4c   : > { %604 = dma.done.wait (%p771_p7), %s144_s2, 2048  }
  0x4d   : > { %606 = vsyncadd (%p771_p7), %s144_s2, 4294965248  ;;  %v168_v0 = vld [vmem:[%s849_s20] sm:$0xff]  ;;  %v169_v1 = vld [vmem:[%s849_s20 + $0x8] sm:$0xff]  ;;  %s163_s11 = sand.u32 1, %s617_s7   ;;  %s365_s24 = sshll.u32 %s645_s14, 5 }
  0x4e   : > { %184 = vxpose.xlu0.b32.start [1/16] %v168_v0, 128  ;;  %v170_v2 = vld [vmem:[%s849_s20 + $0x10] sm:$0xff]  ;;  %v171_v3 = vld [vmem:[%s849_s20 + $0x18] sm:$0xff]  ;;  %v172_v4 = vld [vmem:[%s849_s20 + $0x20] sm:$0xff]  ;;  %s358_s28 = sshll.u32 %s163_s11, 7  ;;  %s368_s25 = smul.u32 96, %s637_s12 }
  0x4f   : > { %v173_v5 = vld [vmem:[%s849_s20 + $0x28] sm:$0xff]  ;;  %v174_v6 = vld [vmem:[%s849_s20 + $0x30] sm:$0xff]  ;;  %v175_v7 = vld [vmem:[%s849_s20 + $0x38] sm:$0xff]  ;;  %s874_s3 = scalar_lea.vmem [#allocation5], %s358_s28  ;;  %s245_s4 = sadd.s32 %s641_s13, %s365_s24 }
  0x50   : > { %v176_v8 = vld [vmem:[%s849_s20 + $0x40] sm:$0xff]  ;;  %v177_v9 = vld [vmem:[%s849_s20 + $0x48] sm:$0xff]  ;;  %v178_v10 = vld [vmem:[%s849_s20 + $0x50] sm:$0xff]  ;;  %s247_s5 = sadd.s32 %s368_s25, %s245_s4  ;;  %s250_s29 = sshll.u32 %s874_s3, 4  ;;  %s900_s29 = int_to_ptr.vmem [resolvable:$true] %s250_s29 }
  0x51   : > { %v179_v11 = vld [vmem:[%s849_s20 + $0x58] sm:$0xff]  ;;  %v180_v12 = vld [vmem:[%s849_s20 + $0x60] sm:$0xff]  ;;  %v181_v13 = vld [vmem:[%s849_s20 + $0x68] sm:$0xff]  ;;  %s362_s30 = sshll.u32 %s247_s5, 7  ;;  %s905_s12 = scalar_lea.sflag [#allocation4], %s163_s11 }
  0x52   : > { %185 = vxpose.xlu0.b32.cont [2/16] %v169_v1, 128  ;;  %v182_v14 = vld [vmem:[%s849_s20 + $0x70] sm:$0xff]  ;;  %v183_v15 = vld [vmem:[%s849_s20 + $0x78] sm:$0xff]  ;;  %s898_s22 = scalar_lea.hbm %s979_s1, %s362_s30  ;;  %s523_s13 = scalar_lea.vmem %s900_s29, 2048 }
  0x53   : > { %p524_p7 = scmp.ne.s32.totalorder %s900_s29, %s523_s13  ;;  %p995_p1 = scmp.ne.s32.totalorder %s991_s9, 0 }
  0x54   : > { %s667_s14 = smov [#allocation5]  }
  0x55   : > { %p525_p2 = pnand %p524_p7, %p995_p1  ;;  %s527_s23 = sshll.u32 %s667_s14, 4  ;;  %s528_s23 = int_to_ptr.vmem [resolvable:$false] %s527_s23 }
  0x56   : > { %186 = vxpose.xlu0.b32.cont [3/16] %v170_v2, 128  ;;  %s529_s2 = scalar_lea.vmem %s528_s23, 4096  ;;  %p530_p0 = scmp.lt.s32.totalorder %s900_s29, %s528_s23 }
  0x57   : > { %p526_p4 = pneg %p525_p2  ;;  %p531_p3 = scmp.lt.s32.totalorder %s529_s2, %s523_s13 }
  0x59   : > { %p532_p6 = por %p531_p3, %p530_p0 }
  0x5a   : > { %187 = vxpose.xlu0.b32.cont [4/16] %v171_v3, 128 }
  0x5b   : > { %p533_p8 = pnand %p532_p6, %p526_p4 }
  0x5e   : > { %188 = vxpose.xlu0.b32.cont [5/16] %v172_v4, 128 }
  0x62   : > { %189 = vxpose.xlu0.b32.cont [6/16] %v173_v5, 128 }
  0x66   : > { %190 = vxpose.xlu0.b32.cont [7/16] %v174_v6, 128 }
  0x6a   : > { %191 = vxpose.xlu0.b32.cont [8/16] %v175_v7, 128 }
  0x6e   : > { %192 = vxpose.xlu0.b32.cont [9/16] %v176_v8, 128 }
  0x72   : > { %193 = vxpose.xlu0.b32.cont [10/16] %v177_v9, 128 }
  0x76   : > { %194 = vxpose.xlu0.b32.cont [11/16] %v178_v10, 128 }
  0x7a   : > { %195 = vxpose.xlu0.b32.cont [12/16] %v179_v11, 128 }
  0x7e   : > { %196 = vxpose.xlu0.b32.cont [13/16] %v180_v12, 128 }
  0x82   : > { %197 = vxpose.xlu0.b32.cont [14/16] %v181_v13, 128 }
  0x86   : > { %198 = vxpose.xlu0.b32.cont [15/16] %v182_v14, 128 }
  0x8a   : > { %199 = vxpose.xlu0.b32.end [16/16] %v183_v15, 128 }
  0xce   : > { %v200_v16 = vpop.trf.xlu0 }
  0xcf   : > { %216 = vst [vmem:[%s874_s3] sm:$0xff] %v200_v16 }
  0xd2   : > { %v201_v17 = vpop.trf.xlu0 }
  0xd3   : > { %217 = vst [vmem:[%s874_s3 + $0x8] sm:$0xff] %v201_v17 }
  0xd6   : > { %v202_v18 = vpop.trf.xlu0 }
  0xd7   : > { %218 = vst [vmem:[%s874_s3 + $0x10] sm:$0xff] %v202_v18 }
  0xda   : > { %v203_v19 = vpop.trf.xlu0 }
  0xdb   : > { %219 = vst [vmem:[%s874_s3 + $0x18] sm:$0xff] %v203_v19 }
  0xde   : > { %v204_v20 = vpop.trf.xlu0 }
  0xdf   : > { %220 = vst [vmem:[%s874_s3 + $0x20] sm:$0xff] %v204_v20 }
  0xe2   : > { %v205_v21 = vpop.trf.xlu0 }
  0xe3   : > { %221 = vst [vmem:[%s874_s3 + $0x28] sm:$0xff] %v205_v21 }
  0xe6   : > { %v206_v22 = vpop.trf.xlu0 }
  0xe7   : > { %222 = vst [vmem:[%s874_s3 + $0x30] sm:$0xff] %v206_v22 }
  0xea   : > { %v207_v23 = vpop.trf.xlu0 }
  0xeb   : > { %223 = vst [vmem:[%s874_s3 + $0x38] sm:$0xff] %v207_v23 }
  0xee   : > { %v208_v24 = vpop.trf.xlu0 }
  0xef   : > { %224 = vst [vmem:[%s874_s3 + $0x40] sm:$0xff] %v208_v24 }
  0xf2   : > { %v209_v25 = vpop.trf.xlu0 }
  0xf3   : > { %225 = vst [vmem:[%s874_s3 + $0x48] sm:$0xff] %v209_v25 }
  0xf6   : > { %v210_v26 = vpop.trf.xlu0 }
  0xf7   : > { %226 = vst [vmem:[%s874_s3 + $0x50] sm:$0xff] %v210_v26 }
  0xfa   : > { %v211_v27 = vpop.trf.xlu0 }
  0xfb   : > { %227 = vst [vmem:[%s874_s3 + $0x58] sm:$0xff] %v211_v27 }
  0xfe   : > { %v212_v28 = vpop.trf.xlu0 }
  0xff   : > { %228 = vst [vmem:[%s874_s3 + $0x60] sm:$0xff] %v212_v28 }
 0x102   : > { %v213_v29 = vpop.trf.xlu0 }
 0x103   : > { %229 = vst [vmem:[%s874_s3 + $0x68] sm:$0xff] %v213_v29 }
 0x106   : > { %v214_v30 = vpop.trf.xlu0 }
 0x107   : > { %230 = vst [vmem:[%s874_s3 + $0x70] sm:$0xff] %v214_v30 }
 0x10a   : > { %v215_v31 = vpop.trf.xlu0 }
 0x10b   : > { %231 = vst [vmem:[%s874_s3 + $0x78] sm:$0xff] %v215_v31 }
 0x10c   : > { %536 = shalt.err (!%p533_p8)
}
 0x10d   : > { %s537_s20 = scalar_lea.hbm %s898_s22, 2048  ;;  %s541_s3 = scalar_lea.hbm %s979_s1, 24576 }
 0x10e   : > { %p538_p10 = scmp.ne.s32.totalorder %s898_s22, %s537_s20  ;;  %p542_p5 = scmp.lt.u32.totalorder %s898_s22, %s979_s1 }
 0x10f   : > { %p543_p9 = scmp.lt.u32.totalorder %s541_s3, %s537_s20  ;;  %p545_p7 = scmp.lt.u32.totalorder %s537_s20, %s898_s22 }
 0x110   : > { %p539_p11 = pnand %p538_p10, %p995_p1 }
 0x111   : > { %p544_p13 = por %p543_p9, %p542_p5 }
 0x112   : > { %p540_p12 = pneg %p539_p11 }
 0x113   : > { %p546_p2 = por %p545_p7, %p544_p13 }
 0x115   : > { %p547_p4 = pnand %p546_p2, %p540_p12 }
 0x117   : > { %550 = shalt.err (!%p547_p4)
}
 0x118   : > { %s668_s4 = smov 128   ;;  %s669_s5 = smov 256  }
 0x119   : > { %s670_s30 = smov 8  }
 0x11a   : > { %371 = dma.vmem_to_hbm [thread:$0]  (%p995_p1), %s900_s29, 2048, %s898_s22, %s905_s12, %s668_s4, %s669_s5, %s670_s30  }
 0x11b PF: > { %p382_p0 = scmp.ge.s32.totalorder %s661_s18, 2  ;;  %s265_s26 = sand.u32 1, %s613_s6  }
 0x11c   : > { %p996_p3 = scmp.ne.s32.totalorder %s993_s21, 0  ;;  %s266_s27 = scalar_lea.sflag [#allocation4], %s265_s26 }
 0x11e   : > { %p378_p6 = pnand %p382_p0, %p996_p3 }
 0x120   : > { %608 = dma.done.wait (!%p378_p6), %s266_s27, 2048  }
 0x121   : > { %610 = vsyncadd (!%p378_p6), %s266_s27, 4294965248  ;;  %s17_s18 = sadd.s32 1, %s661_s18   ;;  %s998_s29 = sld [smem:[#allocation8_spill]] }
 0x122   : > { %p934_p8 = scmp.ge.s32.totalorder %s17_s18, 14   ;;  %s999_s11 = sld [smem:[#allocation12_spill]] }
 0x123   : > { %s1000_s21 = sld [smem:[#allocation9_spill]]  ;;  %s1001_s22 = sld [smem:[#allocation10_spill]] }
 0x124   : > { %s1002_s23 = sld [smem:[#allocation11_spill]]  ;;  %s1004_s6 = smov %s617_s7 }
 0x125   : > { %s1005_s7 = smov %s621_s8  ;;  %s1006_s8 = smov %s794_s19 }
 0x126   : > { %s1007_s9 = smov %s629_s10  ;;  %s1009_s12 = smov %s649_s15 }
 0x127   : > { %s1008_s10 = smov %s998_s29  ;;  %s1010_s13 = smov %s653_s16 }
 0x128   : > { %s1011_s14 = smov %s657_s17  ;;  %16 = sbr.rel (!%p934_p8) target bundleno = 10 (0xa), region = 69 }
 0x129   : > { %s1012_s15 = smov %s1000_s21  ;;  %s1013_s16 = smov %s1001_s22 }
 0x12a   : > { %s1014_s17 = smov %s1002_s23 }
 0x12f   :  { %271 = vsyncpa [#allocation3], 1 }
 0x130   :  { %273 = vsyncpa [#allocation3 + $0x1], 1 }
 0x131   :  { %274 = vsyncpa [#allocation4], 1 }
 0x132   :  { %276 = vsyncpa [#allocation4 + $0x1], 1 }

</bundles_post_ra>
